<compile_context>
chip_gen: v7x
topology: tpu7x:2x2x1
jax: 0.10.0
libtpu: 0.0.40
codegen_flags: <defaults>
</compile_context>

<pallas_src>
import functools
import math

import numpy as np
import jax
import jax.numpy as jnp
from jax import lax
from jax.experimental import pallas as pl
from jax.experimental.pallas import tpu as pltpu

_SQRT2 = math.sqrt(2.0)
_TWO_PI = 2.0 * math.pi
_GATE_LANES = 128            # pad the 3-way logic gate to one full lane tile


# --------------- in-kernel math helpers (only ops guaranteed to lower) -----------
def _erf(x):
    """Abramowitz & Stegun 7.1.26 erf (max abs err ~1.5e-7, i.e. f32-exact)."""
    a1, a2, a3, a4, a5 = (0.254829592, -0.284496736, 1.421413741,
                          -1.453152027, 1.061405429)
    p = 0.3275911
    ax = jnp.abs(x)
    t = 1.0 / (1.0 + p * ax)
    poly = ((((a5 * t + a4) * t + a3) * t + a2) * t + a1) * t
    y = 1.0 - poly * jnp.exp(-ax * ax)
    return jnp.where(x < 0.0, -y, y)


def _gelu_exact(x):
    """PyTorch nn.GELU() default (exact, erf-based)."""
    return 0.5 * x * (1.0 + _erf(x / _SQRT2))


def _sin(x):
    """sin(x): range-reduce to [-pi, pi] then odd Taylor poly (abs err < 1e-6)."""
    k = jnp.floor(x / _TWO_PI + 0.5)
    r = x - k * _TWO_PI
    r2 = r * r
    coeffs = (-7.647163731819816e-13, 1.6059043836821613e-10,
              -2.505210838544172e-08, 2.7557319223985893e-06,
              -1.984126984126984e-04, 8.333333333333333e-03,
              -1.666666666666667e-01)
    p = coeffs[0]
    for c in coeffs[1:]:
        p = p * r2 + c
    return r + r * r2 * p


# ------------------------ per-chip VMEM / tiling helpers ---------------------------
@functools.lru_cache(maxsize=None)
def _chip_info():
    """(vmem_capacity_bytes, default_scoped_vmem_bytes, num_tensorcores_per_chip)."""
    kind = ""
    try:
        kind = jax.devices()[0].device_kind.lower()
    except Exception:
        pass
    vmem_cap = None
    try:
        vmem_cap = int(pltpu.get_tpu_info().vmem_capacity_bytes)
    except Exception:
        vmem_cap = None
    if not vmem_cap or vmem_cap <= 0:
        vmem_cap = (64 << 20) if "v7" in kind else (128 << 20)
    default_scoped = (16 << 20) if "v5" in kind else (32 << 20)
    n_tc = 2 if "v7" in kind else 1
    return vmem_cap, default_scoped, n_tc


def _vmem_budget():
    vmem_cap, _, _ = _chip_info()
    return int(0.85 * vmem_cap)


def _compiler_params(semantics, vmem_needed):
    """Raise the scoped-VMEM limit whenever the working set exceeds the chip default,
    capped below the chip's physical VMEM (64 MiB on v7x, 128 MiB on v5e/v6e)."""
    vmem_cap, default_scoped, _ = _chip_info()
    if vmem_needed > default_scoped:
        limit = int(min(vmem_needed + (2 << 20), int(0.9 * vmem_cap)))
        limit = max(limit, default_scoped)
        return pltpu.CompilerParams(dimension_semantics=semantics,
                                    vmem_limit_bytes=limit)
    return pltpu.CompilerParams(dimension_semantics=semantics)


_M_CANDIDATES = (1024, 512, 256, 128, 64, 32, 16, 8)
_LANE_CANDIDATES = (512, 256, 128)       # prefer 256-multiples for v6e/v7x 2x256 MXU


def _lane_tile(n):
    for c in _LANE_CANDIDATES:
        if n % c == 0:
            return c
    return n


def _row_tile(n, fits, n_tc, other_parallel_steps=1):
    """Largest row (M) tile dividing n that fits the per-chip VMEM budget."""
    choices = [c for c in _M_CANDIDATES if c <= n and n % c == 0] or [n]
    tm = next((c for c in choices if fits(c)), choices[-1])
    # v7x megacore only: keep >=2 parallel grid steps so both TensorCores get work
    # (halving on single-TC v5e/v6e would just double overhead + weight re-streaming).
    if n_tc >= 2 and (n // tm) * other_parallel_steps < 2 and tm % 16 == 0:
        tm //= 2
    return tm


def _batch_tile(B, S, fits):
    """Batches per grid step: keep Bt*S rows (8,128)-legal and inside the budget."""
    divs = [d for d in range(B, 0, -1) if B % d == 0]
    legal = [d for d in divs if (d * S) % 8 == 0 or d == B]
    return next((d for d in legal if fits(d)), legal[-1])


# ------------------------------- GeneralProcessor ---------------------------------
def _general_kernel(x_ref, w1_ref, b1_ref, w2_ref, b2_ref, o_ref):
    j = pl.program_id(1)
    h = jnp.dot(x_ref[...], w1_ref[...], preferred_element_type=jnp.float32) + b1_ref[...]
    h = _gelu_exact(h)
    contrib = jnp.dot(h, w2_ref[...], preferred_element_type=jnp.float32)

    # Accumulate directly into the resident f32 output block (no scratch copy).
    @pl.when(j == 0)
    def _():
        o_ref[...] = contrib + b2_ref[...]

    @pl.when(j != 0)
    def _():
        o_ref[...] += contrib


def general_forward(params, x):
    B, S, D = x.shape
    w1, b1, w2, b2 = params["w1"], params["b1"], params["w2"], params["b2"]
    H = w1.shape[1]                                    # 2 * d_model
    M = B * S
    _, _, n_tc = _chip_info()
    budget = _vmem_budget()
    th = _lane_tile(H)
    # TODO(synk): also tile the d_model (K) axis of the first matmul for very large D.

    def _need(tm):
        return 4 * (2 * tm * D                         # x block, double-buffered
                    + 2 * tm * D                       # output block (accumulator)
                    + 2 * (D * th + th + th * D + D)   # weight/bias blocks
                    + tm * th + tm * D)                # h / contribution temporaries

    tm = _row_tile(M, lambda t: _need(t) <= budget, n_tc)
    cost = pl.CostEstimate(
        flops=4 * M * D * H,
        transcendentals=M * H,
        bytes_accessed=4 * (2 * M * D + (M // tm) * (D * H + H + H * D + D)))

    out = pl.pallas_call(
        _general_kernel,
        out_shape=jax.ShapeDtypeStruct((M, D), jnp.float32),
        grid=(M // tm, H // th),                       # hidden (reduction) axis last
        in_specs=[
            pl.BlockSpec((tm, D), lambda i, j: (i, 0)),
            pl.BlockSpec((D, th), lambda i, j: (0, j)),
            pl.BlockSpec((1, th), lambda i, j: (0, j)),
            pl.BlockSpec((th, D), lambda i, j: (j, 0)),
            pl.BlockSpec((1, D), lambda i, j: (0, 0)),
        ],
        out_specs=pl.BlockSpec((tm, D), lambda i, j: (i, 0)),
        compiler_params=_compiler_params(("parallel", "arbitrary"), _need(tm)),
        cost_estimate=cost,
    )(x.reshape(M, D), w1, b1, w2, b2)
    return out.reshape(B, S, D)


# -------------------------------- GenerativeUnit ----------------------------------
def _generative_kernel(x_ref, w_ref, b_ref, o_ref):
    y = jnp.dot(x_ref[...], w_ref[...], preferred_element_type=jnp.float32) + b_ref[...]
    o_ref[...] = _sin(y).astype(o_ref.dtype)


def generative_forward(params, x):
    B, S, D = x.shape
    w, b = params["w"], params["b"]
    M = B * S
    _, _, n_tc = _chip_info()
    budget = _vmem_budget()
    tn = _lane_tile(D)                                 # column tiling: weight never fully resident

    def _need(tm):
        return 4 * (2 * tm * D + 2 * tm * tn + 2 * (D * tn + tn) + 2 * tm * tn)

    tm = _row_tile(M, lambda t: _need(t) <= budget, n_tc,
                   other_parallel_steps=D // tn)
    cost = pl.CostEstimate(
        flops=2 * M * D * D,
        transcendentals=0,
        bytes_accessed=4 * (2 * M * D + (M // tm) * (D * D + D)))

    out = pl.pallas_call(
        _generative_kernel,
        out_shape=jax.ShapeDtypeStruct((M, D), x.dtype),
        grid=(M // tm, D // tn),
        in_specs=[pl.BlockSpec((tm, D), lambda i, j: (i, 0)),
                  pl.BlockSpec((D, tn), lambda i, j: (0, j)),
                  pl.BlockSpec((1, tn), lambda i, j: (0, j))],
        out_specs=pl.BlockSpec((tm, tn), lambda i, j: (i, j)),
        compiler_params=_compiler_params(("parallel", "parallel"), _need(tm)),
        cost_estimate=cost,
    )(x.reshape(M, D), w, b)
    return out.reshape(B, S, D)


# --------------------------------- PatternMatcher ---------------------------------
def _pattern_kernel(x_ref, w_ref, b_ref, o_ref, *, seq_len):
    # x_ref: (Bt*seq_len, D) rows ordered batch-major.  w_ref: (3*D, tn) fused taps
    # [w0; w1; w2].  out[t] = relu(x[t-1]@w0 + x[t]@w1 + x[t+1]@w2 + b), zero padded.
    x = x_ref[...]
    R, D = x.shape
    n_b = R // seq_len
    row = lax.broadcasted_iota(jnp.int32, (R, D), 0)
    first = row == 0
    last = row == seq_len - 1
    for b in range(1, n_b):                            # static unroll: per-batch boundaries
        first = first | (row == b * seq_len)
        last = last | (row == (b + 1) * seq_len - 1)
    # Shift on the LHS (XLU roll + boundary mask); this also zeroes cross-batch rows.
    x_prev = jnp.where(first, 0.0, pltpu.roll(x, shift=1, axis=0))       # x[t-1]
    x_next = jnp.where(last, 0.0, pltpu.roll(x, shift=R - 1, axis=0))    # x[t+1]
    x3 = jnp.concatenate([x_prev, x, x_next], axis=-1)                   # (R, 3D)
    y = jnp.dot(x3, w_ref[...], preferred_element_type=jnp.float32) + b_ref[...]
    o_ref[...] = jnp.maximum(y, 0.0).astype(o_ref.dtype)


def pattern_forward(params, x):
    B, S, D = x.shape
    w, b = params["w"], params["b"]                    # w: (3, D, D) taps, b: (1, D)
    w_fused = w.reshape(3 * D, D)                      # single K=3D weight
    M = B * S
    budget = _vmem_budget()
    tn = _lane_tile(D)
    # TODO(synk): for very large S*D, also tile the sequence axis with a 1-row halo.

    def _need(bt):
        r = bt * S
        return 4 * (2 * r * D + 2 * r * tn             # x / out blocks, double-buffered
                    + 2 * (3 * D * tn + tn)            # weight/bias column tiles
                    + 6 * r * D + 2 * r * tn)          # x_prev/x_next/x3/y temporaries

    Bt = _batch_tile(B, S, lambda bt: _need(bt) <= budget)
    R = Bt * S
    cost = pl.CostEstimate(
        flops=2 * M * (3 * D) * D,
        transcendentals=0,
        bytes_accessed=4 * (2 * M * D + (B // Bt) * (3 * D * D + D)))

    out = pl.pallas_call(
        functools.partial(_pattern_kernel, seq_len=S),
        out_shape=jax.ShapeDtypeStruct((M, D), x.dtype),
        grid=(B // Bt, D // tn),
        in_specs=[pl.BlockSpec((R, D), lambda bi, j: (bi, 0)),
                  pl.BlockSpec((3 * D, tn), lambda bi, j: (0, j)),
                  pl.BlockSpec((1, tn), lambda bi, j: (0, j))],
        out_specs=pl.BlockSpec((R, tn), lambda bi, j: (bi, j)),
        compiler_params=_compiler_params(("parallel", "parallel"), _need(Bt)),
        cost_estimate=cost,
    )(x.reshape(M, D), w_fused, b)
    return out.reshape(B, S, D)


# -------------------------------- SymbolicLogicUnit -------------------------------
def _symbolic_kernel(x_ref, wp_ref, bp_ref, wc_ref, bc_ref, wd_ref, bd_ref, o_ref,
                     lw0_ref, lw1_ref, lw2_ref, *, seq_len):
    k = pl.program_id(1)
    x = x_ref[...]                                     # (R, D), rows batch-major
    R = x.shape[0]
    n_b = R // seq_len

    # Gate softmax over the 3 logic ops: one small MXU matmul against the 128-lane
    # padded wc; computed once per batch block (k == 0) and cached in VMEM scratch.
    @pl.when(k == 0)
    def _():
        gl = jnp.dot(x, wc_ref[...], preferred_element_type=jnp.float32) + bc_ref[...]
        l0, l1, l2 = gl[:, 0:1], gl[:, 1:2], gl[:, 2:3]
        m = jnp.maximum(jnp.maximum(l0, l1), l2)
        e0, e1, e2 = jnp.exp(l0 - m), jnp.exp(l1 - m), jnp.exp(l2 - m)
        inv = 1.0 / (e0 + e1 + e2)
        lw0_ref[...] = e0 * inv
        lw1_ref[...] = e1 * inv
        lw2_ref[...] = e2 * inv

    props = jax.nn.sigmoid(
        jnp.dot(x, wp_ref[...], preferred_element_type=jnp.float32) + bp_ref[...])  # (R, tk)

    # Fuzzy AND / OR: per-batch products over the sequence in log space; column-wise,
    # so they tile with the wp/wd column axis.  1 - props is reused for NOT and OR.
    one_minus = 1.0 - props
    log_p = jnp.log(jnp.maximum(props, 1e-30))
    log_q = jnp.log(jnp.maximum(one_minus, 1e-30))
    and_rows, or_rows = [], []
    for b in range(n_b):                               # static unroll over batches in block
        sl = slice(b * seq_len, (b + 1) * seq_len)
        a = jnp.exp(jnp.sum(log_p[sl], axis=0, keepdims=True))           # (1, tk)
        o = 1.0 - jnp.exp(jnp.sum(log_q[sl], axis=0, keepdims=True))     # (1, tk)
        and_rows.append(jnp.broadcast_to(a, (seq_len, a.shape[-1])))
        or_rows.append(jnp.broadcast_to(o, (seq_len, o.shape[-1])))
    and_res = jnp.concatenate(and_rows, axis=0) if n_b > 1 else and_rows[0]
    or_res = jnp.concatenate(or_rows, axis=0) if n_b > 1 else or_rows[0]

    logical = lw0_ref[...] * and_res + lw1_ref[...] * or_res + lw2_ref[...] * one_minus
    contrib = jnp.dot(logical, wd_ref[...], preferred_element_type=jnp.float32)      # (R, D)

    @pl.when(k == 0)
    def _():
        o_ref[...] = contrib + bd_ref[...]

    @pl.when(k != 0)
    def _():
        o_ref[...] += contrib


def symbolic_forward(params, x):
    B, S, D = x.shape
    wp, bp, wd, bd = params["wp"], params["bp"], params["wd"], params["bd"]
    wc, bc = params["wc"], params["bc"]                # (D, 3), (1, 3)
    wc_pad = jnp.pad(wc, ((0, 0), (0, _GATE_LANES - wc.shape[1])))
    bc_pad = jnp.pad(bc, ((0, 0), (0, _GATE_LANES - bc.shape[1])))
    M = B * S
    budget = _vmem_budget()
    tk = _lane_tile(D)                                 # wp-column / wd-row tile

    def _need(bt):
        r = bt * S
        return 4 * (2 * r * D + 2 * r * D              # x / out (accumulator) blocks
                    + 2 * (D * tk + tk + tk * D + D + D * _GATE_LANES + _GATE_LANES)
                    + 6 * r * tk + r * D + 3 * r)      # temporaries + lw scratches

    Bt = _batch_tile(B, S, lambda bt: _need(bt) <= budget)
    R = Bt * S
    cost = pl.CostEstimate(
        flops=4 * M * D * D + 2 * M * D * _GATE_LANES,
        transcendentals=4 * M * D,
        bytes_accessed=4 * (2 * M * D + (B // Bt) * (2 * D * D + D * _GATE_LANES + 3 * D)))

    out = pl.pallas_call(
        functools.partial(_symbolic_kernel, seq_len=S),
        out_shape=jax.ShapeDtypeStruct((M, D), jnp.float32),
        grid=(B // Bt, D // tk),                       # logic-column (reduction) axis last
        in_specs=[pl.BlockSpec((R, D), lambda bi, k: (bi, 0)),
                  pl.BlockSpec((D, tk), lambda bi, k: (0, k)),
                  pl.BlockSpec((1, tk), lambda bi, k: (0, k)),
                  pl.BlockSpec((D, _GATE_LANES), lambda bi, k: (0, 0)),
                  pl.BlockSpec((1, _GATE_LANES), lambda bi, k: (0, 0)),
                  pl.BlockSpec((tk, D), lambda bi, k: (k, 0)),
                  pl.BlockSpec((1, D), lambda bi, k: (0, 0))],
        out_specs=pl.BlockSpec((R, D), lambda bi, k: (bi, 0)),
        scratch_shapes=[pltpu.VMEM((R, 1), jnp.float32)] * 3,
        compiler_params=_compiler_params(("parallel", "arbitrary"), _need(Bt)),
        cost_estimate=cost,
    )(x.reshape(M, D), wp, bp, wc_pad, bc_pad, wd, bd)
    return out.reshape(B, S, D)


# --------------------------- ExpertModule: params + dispatch ----------------------
def _linear_params(key, fan_in, fan_out):
    kw, kb = jax.random.split(key)
    bound = 1.0 / math.sqrt(fan_in)
    w = jax.random.uniform(kw, (fan_in, fan_out), jnp.float32, -bound, bound)
    b = jax.random.uniform(kb, (1, fan_out), jnp.float32, -bound, bound)
    return w, b


def init_expert_params(key, d_model, expert_type="general"):
    keys = jax.random.split(key, 4)
    if expert_type == "general":
        w1, b1 = _linear_params(keys[0], d_model, 2 * d_model)
        w2, b2 = _linear_params(keys[1], 2 * d_model, d_model)
        return dict(w1=w1, b1=b1, w2=w2, b2=b2)
    if expert_type == "generative":
        w, b = _linear_params(keys[0], d_model, d_model)
        return dict(w=w, b=b)
    if expert_type == "pattern":
        kw, kb = jax.random.split(keys[0])
        bound = 1.0 / math.sqrt(d_model * 3)
        w_conv = jax.random.uniform(kw, (d_model, d_model, 3), jnp.float32, -bound, bound)
        w = jnp.transpose(w_conv, (2, 1, 0))           # (k, in, out) tap matrices
        b = jax.random.uniform(kb, (1, d_model), jnp.float32, -bound, bound)
        return dict(w=w, b=b)
    if expert_type == "symbolic":
        wp, bp = _linear_params(keys[0], d_model, d_model)
        wc, bc = _linear_params(keys[1], d_model, 3)
        wd, bd = _linear_params(keys[2], d_model, d_model)
        return dict(wp=wp, bp=bp, wc=wc, bc=bc, wd=wd, bd=bd)
    raise ValueError(expert_type)


def expert_forward(params, x, expert_type="general"):
    """Pallas implementation of ExpertModule(d_model, expert_type).forward(x)."""
    if expert_type == "symbolic":
        return symbolic_forward(params, x)
    if expert_type == "pattern":
        return pattern_forward(params, x)
    if expert_type == "generative":
        return generative_forward(params, x)
    return general_forward(params, x)


# ------------------------------ pure-JAX reference --------------------------------
def _ref_forward(params, x, expert_type):
    if expert_type == "general":
        h = x @ params["w1"] + params["b1"]
        h = 0.5 * h * (1.0 + jax.scipy.special.erf(h / _SQRT2))
        return h @ params["w2"] + params["b2"]
    if expert_type == "generative":
        return jnp.sin(x @ params["w"] + params["b"])
    if expert_type == "pattern":
        S = x.shape[1]
        xp = jnp.pad(x, ((0, 0), (1, 1), (0, 0)))
        acc = sum(jnp.einsum("bsd,de->bse", xp[:, k:k + S, :], params["w"][k])
                  for k in range(3))
        return jax.nn.relu(acc + params["b"])
    if expert_type == "symbolic":
        props = jax.nn.sigmoid(x @ params["wp"] + params["bp"])
        lw = jax.nn.softmax(x @ params["wc"] + params["bc"], axis=-1)
        and_r = jnp.prod(props, axis=1, keepdims=True)
        or_r = 1.0 - jnp.prod(1.0 - props, axis=1, keepdims=True)
        not_r = 1.0 - props
        logical = lw[..., 0:1] * and_r + lw[..., 1:2] * or_r + lw[..., 2:3] * not_r
        return logical @ params["wd"] + params["bd"]
    raise ValueError(expert_type)


if __name__ == "__main__":
    B, S, D = 2, 8, 32
    key = jax.random.PRNGKey(0)
    kx, kp = jax.random.split(key)
    x = jax.random.normal(kx, (B, S, D), jnp.float32)

    for i, et in enumerate(["general", "generative", "pattern", "symbolic"]):
        params = init_expert_params(jax.random.fold_in(kp, i), D, et)
        y = jax.block_until_ready(expert_forward(params, x, et))
        assert y.shape == (B, S, D)
        y_ref = _ref_forward(params, x, et)
        np.testing.assert_allclose(np.asarray(y), np.asarray(y_ref),
                                   rtol=2e-4, atol=2e-4)
    print("KERNEL_OK")
</pallas_src>

<mosaic_0001>
module attributes {stable_mosaic.version = 11 : i64} {
  func.func @_general_kernel(%arg0: i32, %arg1: i32, %arg2: memref<16x32xf32, #tpu.memory_space<vmem>>, %arg3: memref<32x64xf32, #tpu.memory_space<vmem>>, %arg4: memref<1x64xf32, #tpu.memory_space<vmem>>, %arg5: memref<64x32xf32, #tpu.memory_space<vmem>>, %arg6: memref<1x32xf32, #tpu.memory_space<vmem>>, %arg7: memref<16x32xf32, #tpu.memory_space<vmem>>) attributes {dimension_semantics = [#tpu.dimension_semantics<parallel>, #tpu.dimension_semantics<arbitrary>], iteration_bounds = array<i64: 1, 1>, scalar_prefetch = 0 : i64, scratch_operands = 0 : i64, tpu.core_type = #tpu.core_type<tc>, window_params = [{transform_indices = @transform_0, window_bounds = array<i64: 16, 32>}, {transform_indices = @transform_1, window_bounds = array<i64: 32, 64>}, {transform_indices = @transform_2, window_bounds = array<i64: 1, 64>}, {transform_indices = @transform_3, window_bounds = array<i64: 64, 32>}, {pipeline_mode = #tpu.pipeline_mode<synchronous>, transform_indices = @transform_4, window_bounds = array<i64: 1, 32>}, {transform_indices = @transform_5, window_bounds = array<i64: 16, 32>}]} {
    %c0 = arith.constant 0 : index
    %c0_0 = arith.constant 0 : index
    %0 = vector.load %arg2[%c0, %c0_0] : memref<16x32xf32, #tpu.memory_space<vmem>>, vector<16x32xf32>
    %c0_1 = arith.constant 0 : index
    %c0_2 = arith.constant 0 : index
    %1 = vector.load %arg3[%c0_1, %c0_2] : memref<32x64xf32, #tpu.memory_space<vmem>>, vector<32x64xf32>
    %cst = arith.constant dense<0.000000e+00> : vector<16x64xf32>
    %2 = tpu.matmul %0, %1, %cst {dimension_numbers = #tpu.dot_dimension_numbers<[1], [0], [0], [1], [0, 0, 1, 1], [], []>} : vector<16x32xf32>, vector<32x64xf32>, vector<16x64xf32> -> vector<16x64xf32>
    %c0_3 = arith.constant 0 : index
    %c0_4 = arith.constant 0 : index
    %3 = vector.load %arg4[%c0_3, %c0_4] : memref<1x64xf32, #tpu.memory_space<vmem>>, vector<1x64xf32>
    %4 = vector.broadcast %3 : vector<1x64xf32> to vector<16x64xf32>
    %5 = arith.addf %2, %4 : vector<16x64xf32>
    %cst_5 = arith.constant 5.000000e-01 : f32
    %6 = vector.broadcast %cst_5 : f32 to vector<16x64xf32>
    %7 = arith.mulf %6, %5 : vector<16x64xf32>
    %cst_6 = arith.constant 1.41421354 : f32
    %8 = vector.broadcast %cst_6 : f32 to vector<16x64xf32>
    %9 = arith.divf %5, %8 : vector<16x64xf32>
    %10 = math.absf %9 : vector<16x64xf32>
    %cst_7 = arith.constant 0.327591091 : f32
    %11 = vector.broadcast %cst_7 : f32 to vector<16x64xf32>
    %12 = arith.mulf %11, %10 : vector<16x64xf32>
    %cst_8 = arith.constant 1.000000e+00 : f32
    %13 = vector.broadcast %cst_8 : f32 to vector<16x64xf32>
    %14 = arith.addf %13, %12 : vector<16x64xf32>
    %cst_9 = arith.constant 1.000000e+00 : f32
    %15 = vector.broadcast %cst_9 : f32 to vector<16x64xf32>
    %16 = arith.divf %15, %14 : vector<16x64xf32>
    %cst_10 = arith.constant 1.06140542 : f32
    %17 = vector.broadcast %cst_10 : f32 to vector<16x64xf32>
    %18 = arith.mulf %17, %16 : vector<16x64xf32>
    %cst_11 = arith.constant -1.45315206 : f32
    %19 = vector.broadcast %cst_11 : f32 to vector<16x64xf32>
    %20 = arith.addf %18, %19 : vector<16x64xf32>
    %21 = arith.mulf %20, %16 : vector<16x64xf32>
    %cst_12 = arith.constant 1.42141378 : f32
    %22 = vector.broadcast %cst_12 : f32 to vector<16x64xf32>
    %23 = arith.addf %21, %22 : vector<16x64xf32>
    %24 = arith.mulf %23, %16 : vector<16x64xf32>
    %cst_13 = arith.constant -0.284496725 : f32
    %25 = vector.broadcast %cst_13 : f32 to vector<16x64xf32>
    %26 = arith.addf %24, %25 : vector<16x64xf32>
    %27 = arith.mulf %26, %16 : vector<16x64xf32>
    %cst_14 = arith.constant 0.254829586 : f32
    %28 = vector.broadcast %cst_14 : f32 to vector<16x64xf32>
    %29 = arith.addf %27, %28 : vector<16x64xf32>
    %30 = arith.mulf %29, %16 : vector<16x64xf32>
    %cst_15 = arith.constant 0.000000e+00 : f32
    %31 = vector.broadcast %cst_15 : f32 to vector<16x64xf32>
    %32 = arith.subf %31, %10 : vector<16x64xf32>
    %33 = arith.mulf %32, %10 : vector<16x64xf32>
    %34 = math.exp %33 : vector<16x64xf32>
    %35 = arith.mulf %30, %34 : vector<16x64xf32>
    %cst_16 = arith.constant 1.000000e+00 : f32
    %36 = vector.broadcast %cst_16 : f32 to vector<16x64xf32>
    %37 = arith.subf %36, %35 : vector<16x64xf32>
    %cst_17 = arith.constant 0.000000e+00 : f32
    %38 = vector.broadcast %cst_17 : f32 to vector<16x64xf32>
    %39 = arith.cmpf olt, %9, %38 : vector<16x64xf32>
    %cst_18 = arith.constant 0.000000e+00 : f32
    %40 = vector.broadcast %cst_18 : f32 to vector<16x64xf32>
    %41 = arith.subf %40, %37 : vector<16x64xf32>
    %42 = arith.select %39, %41, %37 : vector<16x64xi1>, vector<16x64xf32>
    %cst_19 = arith.constant 1.000000e+00 : f32
    %43 = vector.broadcast %cst_19 : f32 to vector<16x64xf32>
    %44 = arith.addf %43, %42 : vector<16x64xf32>
    %45 = arith.mulf %7, %44 : vector<16x64xf32>
    %c0_20 = arith.constant 0 : index
    %c0_21 = arith.constant 0 : index
    %46 = vector.load %arg5[%c0_20, %c0_21] : memref<64x32xf32, #tpu.memory_space<vmem>>, vector<64x32xf32>
    %cst_22 = arith.constant dense<0.000000e+00> : vector<16x32xf32>
    %47 = tpu.matmul %45, %46, %cst_22 {dimension_numbers = #tpu.dot_dimension_numbers<[1], [0], [0], [1], [0, 0, 1, 1], [], []>} : vector<16x64xf32>, vector<64x32xf32>, vector<16x32xf32> -> vector<16x32xf32>
    %c0_i32 = arith.constant 0 : i32
    %48 = arith.cmpi eq, %arg1, %c0_i32 : i32
    %49 = arith.extui %48 : i1 to i32
    %c0_i32_23 = arith.constant 0 : i32
    %50 = arith.cmpi ne, %49, %c0_i32_23 : i32
    scf.if %50 {
      %c0_26 = arith.constant 0 : index
      %c0_27 = arith.constant 0 : index
      %54 = vector.load %arg6[%c0_26, %c0_27] : memref<1x32xf32, #tpu.memory_space<vmem>>, vector<1x32xf32>
      %55 = vector.broadcast %54 : vector<1x32xf32> to vector<16x32xf32>
      %56 = arith.addf %47, %55 : vector<16x32xf32>
      %c0_28 = arith.constant 0 : index
      %c0_29 = arith.constant 0 : index
      %57 = vector.load %arg7[%c0_28, %c0_29] : memref<16x32xf32, #tpu.memory_space<vmem>>, vector<16x32xf32>
      tpu.vector_store %arg7[%c0_28, %c0_29], %56 {strides = array<i32>} : memref<16x32xf32, #tpu.memory_space<vmem>>, vector<16x32xf32>,
    } else {
    }
    %c0_i32_24 = arith.constant 0 : i32
    %51 = arith.cmpi ne, %arg1, %c0_i32_24 : i32
    %52 = arith.extui %51 : i1 to i32
    %c0_i32_25 = arith.constant 0 : i32
    %53 = arith.cmpi ne, %52, %c0_i32_25 : i32
    scf.if %53 {
      %c0_26 = arith.constant 0 : index
      %c0_27 = arith.constant 0 : index
      %54 = vector.load %arg7[%c0_26, %c0_27] : memref<16x32xf32, #tpu.memory_space<vmem>>, vector<16x32xf32>
      %55 = arith.addf %54, %47 : vector<16x32xf32>
      %c0_28 = arith.constant 0 : index
      %c0_29 = arith.constant 0 : index
      %56 = vector.load %arg7[%c0_28, %c0_29] : memref<16x32xf32, #tpu.memory_space<vmem>>, vector<16x32xf32>
      tpu.vector_store %arg7[%c0_28, %c0_29], %55 {strides = array<i32>} : memref<16x32xf32, #tpu.memory_space<vmem>>, vector<16x32xf32>,
    } else {
    }
    return
  }
  func.func @transform_0(%arg0: i32, %arg1: i32) -> (i32, i32) {
    %c0_i32 = arith.constant 0 : i32
    %c0_i32_0 = arith.constant 0 : i32
    return %arg0, %c0_i32 : i32, i32
  }
  func.func @transform_1(%arg0: i32, %arg1: i32) -> (i32, i32) {
    %c0_i32 = arith.constant 0 : i32
    %c0_i32_0 = arith.constant 0 : i32
    return %c0_i32, %arg1 : i32, i32
  }
  func.func @transform_2(%arg0: i32, %arg1: i32) -> (i32, i32) {
    %c0_i32 = arith.constant 0 : i32
    %c0_i32_0 = arith.constant 0 : i32
    return %c0_i32, %arg1 : i32, i32
  }
  func.func @transform_3(%arg0: i32, %arg1: i32) -> (i32, i32) {
    %c0_i32 = arith.constant 0 : i32
    %c0_i32_0 = arith.constant 0 : i32
    return %arg1, %c0_i32 : i32, i32
  }
  func.func @transform_4(%arg0: i32, %arg1: i32) -> (i32, i32) {
    %c0_i32 = arith.constant 0 : i32
    %c0_i32_0 = arith.constant 0 : i32
    %c0_i32_1 = arith.constant 0 : i32
    return %c0_i32, %c0_i32_0 : i32, i32
  }
  func.func @transform_5(%arg0: i32, %arg1: i32) -> (i32, i32) {
    %c0_i32 = arith.constant 0 : i32
    %c0_i32_0 = arith.constant 0 : i32
    return %arg0, %c0_i32 : i32, i32
  }
}

</mosaic_0001>

<bundles_post_ra>
// kernel: tpu_custom_call.1
= control target key start
LH: loop header
LB: loop body
LE: loop exit
PB: predicated region body
PF: predicated region fallthrough
CT: control target
= control target key end

     0   :  { %vm34_vm0 = vcmask 261120   ;;  %s510_s0 = inlined_call_operand.vmem [shape: f32[16,32], index: 0, kind: input, shape index: {}]   ;;  %s511_s1 = inlined_call_operand.vmem [shape: f32[32,64], index: 1, kind: input, shape index: {}]   ;;  %s512_s2 = inlined_call_operand.vmem [shape: f32[1,64], index: 2, kind: input, shape index: {}]   ;;  %s513_s3 = inlined_call_operand.vmem [shape: f32[64,32], index: 3, kind: input, shape index: {}]   ;;  %s514_s4 = inlined_call_operand.vmem [shape: f32[1,32], index: 4, kind: input, shape index: {}]   ;;  %s515_s5 = inlined_call_operand.hbm [shape: f32[16,32], index: 5, kind: output, shape index: {}]  }
   0x1   :  { %v23_v0 = vld [vmem:[%s511_s1] sm:$0xff]  ;;  %v24_v1 = vld [vmem:[%s511_s1 + $0x8] sm:$0xff]  ;;  %v25_v2 = vld [vmem:[%s511_s1 + $0x10] sm:$0xff] }
   0x2   :  { %v354_v3 = vpack.c.bf16 %v24_v1, %v23_v0  ;;  %v26_v4 = vld [vmem:[%s511_s1 + $0x18] sm:$0xff]  ;;  %v21_v5 = vld [vmem:[%s510_s0] sm:$0xff] }
   0x3   :  { %v358_v6 = vpack.c.bf16 %v26_v4, %v25_v2  ;;  %332 = vmatprep.mubr.msk.f32.mxu0 %vm34_vm0, %v21_v5 }
   0x4   :  { %10 = vsyncpa [#allocation3], 0  ;;  %355 = vmatprep.subr.bf16.mxu0 %v354_v3  ;;  %v22_v7 = vld [vmem:[%s510_s0 + $0x8] sm:$0xff]  ;;  %v171_v8 = vld [vmem:[%s513_s3] sm:$0xff]  ;;  %vm179_vm3 = vcmask 523264   ;;  %s413_s21 = smov [#allocation2]  }
   0x5   :  { %357 = vmatpush3.bf16.msra.mxu0 %v354_v3  ;;  %v172_v9 = vld [vmem:[%s513_s3 + $0x8] sm:$0xff]  ;;  %v173_v11 = vld [vmem:[%s513_s3 + $0x10] sm:$0xff]  ;;  %v174_v12 = vld [vmem:[%s513_s3 + $0x18] sm:$0xff]  ;;  %s291_s22 = sshll.u32 %s413_s21, 4  ;;  %s292_s22 = int_to_ptr.vmem [resolvable:$true] %s291_s22 }
   0x6   :  { %359 = vmatprep.subr.bf16.mxu0 %v358_v6  ;;  %v362_v10 = vpack.c.bf16 %v172_v9, %v171_v8  ;;  %v366_v13 = vpack.c.bf16 %v174_v12, %v173_v11  ;;  %v175_v14 = vld [vmem:[%s513_s3 + $0x20] sm:$0xff]  ;;  %v176_v15 = vld [vmem:[%s513_s3 + $0x28] sm:$0xff]  ;;  %v177_v17 = vld [vmem:[%s513_s3 + $0x30] sm:$0xff]  ;;  %s389_s23 = scalar_lea.vmem %s292_s22, 256  ;;  %p394_p1 = scmp.lt.s32.totalorder %s292_s22, %s292_s22 }
   0x7   :  { %v370_v16 = vpack.c.bf16 %v176_v15, %v175_v14  ;;  %v178_v18 = vld [vmem:[%s513_s3 + $0x38] sm:$0xff]  ;;  %v302_v20 = vld [vmem:[%s512_s2] ss:$0 sm:$0xff]  ;;  %p390_p0 = scmp.ne.s32.totalorder %s292_s22, %s389_s23  ;;  %p395_p2 = scmp.lt.s32.totalorder %s389_s23, %s389_s23 }
   0x8   :  { %363 = vmatprep.subr.bf16.mxu1 %v362_v10  ;;  %v374_v19 = vpack.c.bf16 %v178_v18, %v177_v17  ;;  %v307_v11 = vld [vmem:[%s514_s4] ss:$0 sm:$0xff] }
   0x9   :  { %361 = vmatpush3.bf16.msra.mxu0 %v358_v6  ;;  %365 = vmatpush3.bf16.msra.mxu1 %v362_v10  ;;  %p396_p3 = por %p395_p2, %p394_p1 }
   0xa   :  { %367 = vmatprep.subr.bf16.mxu1 %v366_v13 }
   0xb   :  { %p397_p4 = pnand %p396_p3, %p390_p0 }
   0xc   :  { %333 = vmatmul.mubr.msk.f32.vlgmr.msra.gmra.mrb[0].mxu0 %vm34_vm0, %v22_v7 }
   0xd   :  { %369 = vmatpush3.bf16.msra.mxu1 %v366_v13 }
   0xe   :  { %371 = vmatprep.subr.bf16.mxu1 %v370_v16 }
  0x11   :  { %373 = vmatpush3.bf16.msra.mxu1 %v370_v16 }
  0x12   :  { %375 = vmatprep.subr.bf16.mxu1 %v374_v19 }
  0x15   :  { %377 = vmatpush3.bf16.msra.mxu1 %v374_v19 }
  0xdf   :  { %v334_v21 = vpop.f32.mrb[0].mxu0 }
  0xe0   :  { %v113_v22 = vadd.f32 %v334_v21, %v302_v20  ;;  %v107_v23 = vpop.f32.mrb[1].mxu0 }
  0xe1   :  { %v108_v24 = vadd.f32 %v302_v20, %v107_v23 }
  0xe2   :  { %v120_v25 = vmul.f32 0.70710677, %v113_v22  ;;  %v117_v8 = vmul.f32 0.5, %v113_v22 }
  0xe3   :  { %v119_v26 = vmul.f32 0.70710677, %v108_v24  ;;  %v116_v6 = vmul.f32 0.5, %v108_v24 }
  0xe4   :  { %v122_v27 = vand.u32 2147483647, %v120_v25  ;;  %vm162_vm1 = vcmp.lt.f32.partialorder %v120_v25, 0.0 }
  0xe5   :  { %v121_v28 = vand.u32 2147483647, %v119_v26  ;;  %vm161_vm2 = vcmp.lt.f32.partialorder %v119_v26, 0.0 }
  0xe6   :  { %v124_v29 = vmul.f32 0.3275911, %v122_v27  ;;  %v150_v33 = vsub.f32 0.0, %v122_v27 }
  0xe7   :  { %v123_v30 = vmul.f32 0.3275911, %v121_v28  ;;  %v149_v34 = vsub.f32 0.0, %v121_v28 }
  0xe8   :  { %v126_v31 = vadd.f32 1.0, %v124_v29  ;;  %v152_v36 = vmul.f32 %v150_v33, %v122_v27 }
  0xe9   :  { %v125_v32 = vadd.f32 1.0, %v123_v30  ;;  %v151_v39 = vmul.f32 %v149_v34, %v121_v28 }
  0xea   :  { %381 = vrcp.f32 %v126_v31  ;;  %v155_v42 = vmul.f32 1.442695, %v152_v36 }
  0xeb   :  { %383 = vrcp.f32 %v125_v32  ;;  %v153_v45 = vmul.f32 1.442695, %v151_v39 }
  0xec   :  { %385 = vpow2.f32 %v155_v42 }
  0xed   :  { %387 = vpow2.f32 %v153_v45 }
  0xf4   :  { %v382_v35 = vpop.eup %381 }
  0xf5   :  { %v384_v37 = vpop.eup %383  ;;  %v132_v38 = vmul.f32 1.0614054, %v382_v35 }
  0xf6   :  { %v131_v40 = vmul.f32 1.0614054, %v384_v37  ;;  %v386_v58 = vpop.eup %385 }
  0xf7   :  { %v134_v41 = vadd.f32 -1.4531521, %v132_v38  ;;  %v388_v60 = vpop.eup %387 }
  0xf8   :  { %v133_v43 = vadd.f32 -1.4531521, %v131_v40 }
  0xf9   :  { %v136_v44 = vmul.f32 %v382_v35, %v134_v41 }
  0xfa   :  { %v135_v46 = vmul.f32 %v384_v37, %v133_v43 }
  0xfb   :  { %v138_v47 = vadd.f32 1.4214138, %v136_v44 }
  0xfc   :  { %v137_v48 = vadd.f32 1.4214138, %v135_v46 }
  0xfd   :  { %v140_v49 = vmul.f32 %v382_v35, %v138_v47 }
  0xfe   :  { %v139_v50 = vmul.f32 %v384_v37, %v137_v48 }
  0xff   :  { %v142_v51 = vadd.f32 -0.28449672, %v140_v49 }
 0x100   :  { %v141_v52 = vadd.f32 -0.28449672, %v139_v50 }
 0x101   :  { %v144_v53 = vmul.f32 %v382_v35, %v142_v51 }
 0x102   :  { %v143_v54 = vmul.f32 %v384_v37, %v141_v52 }
 0x103   :  { %v146_v55 = vadd.f32 0.2548296, %v144_v53 }
 0x104   :  { %v145_v56 = vadd.f32 0.2548296, %v143_v54 }
 0x105   :  { %v148_v57 = vmul.f32 %v382_v35, %v146_v55 }
 0x106   :  { %v147_v59 = vmul.f32 %v384_v37, %v145_v56 }
 0x107   :  { %v158_v61 = vmul.f32 %v386_v58, %v148_v57 }
 0x108   :  { %v157_v62 = vmul.f32 %v388_v60, %v147_v59 }
 0x109   :  { %v160_v63 = vsub.f32 1.0, %v158_v61 }
 0x10a   :  { %v159_v0 = vsub.f32 1.0, %v157_v62 }
 0x10b   :  { %v164_v1 = vsub.f32 0.0, %v160_v63 }
 0x10c   :  { %v163_v2 = vsub.f32 0.0, %v159_v0 }
 0x10d   :  { %v166_v3 = vsel %vm162_vm1, %v164_v1, %v160_v63 }
 0x10e   :  { %v168_v4 = vadd.f32 1.0, %v166_v3  ;;  %v165_v5 = vsel %vm161_vm2, %v163_v2, %v159_v0 }
 0x10f   :  { %v167_v7 = vadd.f32 1.0, %v165_v5 }
 0x110   :  { %v170_v10 = vmul.f32 %v168_v4, %v117_v8 }
 0x111   :  { %v169_v9 = vmul.f32 %v167_v7, %v116_v6 }
 0x113   :  { %351 = vmatprep.mubr.msk.f32.mxu1 %vm179_vm3, %v169_v9 }
 0x114   :  { %352 = vmatmul.mubr.msk.f32.vlgmr.msra.gmra.mrb[0].mxu1 %vm179_vm3, %v170_v10 }
 0x1e7   :  { %v353_v12 = vpop.f32.mrb[0].mxu1 }
 0x1e8   :  { %v273_v13 = vadd.f32 %v353_v12, %v307_v11  ;;  %v252_v14 = vpop.f32.mrb[1].mxu1 }
 0x1e9   :  { %v272_v15 = vadd.f32 %v307_v11, %v252_v14 }
 0x1ea   :  { %275 = vst.msk [vmem:[#allocation2 + $0x8] sm:$0xff] %vm34_vm0, %v273_v13 }
 0x1eb   :  { %274 = vst.msk [vmem:[#allocation2] sm:$0xff] %vm34_vm0, %v272_v15 }
 0x1ec   :  { %400 = shalt.err (!%p397_p4)
}
 0x1ed   :  { %s401_s25 = scalar_lea.hbm %s515_s5, 256 }
 0x1ee   :  { %p402_p5 = scmp.ne.s32.totalorder %s515_s5, %s401_s25  ;;  %p405_p6 = scmp.lt.u32.totalorder %s401_s25, %s515_s5 }
 0x1f0   :  { %p407_p7 = pnand %p405_p6, %p402_p5 }
 0x1f2   :  { %410 = shalt.err (!%p407_p7)
}
 0x1f3   :  { %s414_s30 = smov 128   ;;  %s415_s1 = smov 8  }
 0x1f4   :  { %297 = dma.vmem_to_hbm [thread:$0]  %s292_s22, 256, %s515_s5, [#allocation3], %s414_s30, %s414_s30, %s415_s1  }
 0x1f5   :  { %411 = dma.done.wait [#allocation3], 256  }
 0x1f6   :  { %412 = vsyncadd [#allocation3], 4294967040 }
 0x1f7   :  { %301 = vsyncpa [#allocation3], 1 }

</bundles_post_ra>
